<compile_context>
chip_gen: v5e
topology: v5e:2x2
jax: 0.10.0
libtpu: 0.0.40
codegen_flags: <defaults>
</compile_context>

<pallas_src>
import math

import jax
import jax.numpy as jnp
from jax.experimental import pallas as pl
from jax.experimental.pallas import tpu as pltpu

D_IN = 512
D_HID = 512
D_OUT = 3
D_OUT_PAD = 128  # lane-dense padded output width


def _round_up(x, m):
    return (x + m - 1) // m * m


def _mlp_kernel(x_ref, w1_ref, b1_ref, w2_ref, b2_ref, o_ref):
    # fc1: bf16 operands, f32 accumulate on the MXU; bias + ReLU in f32 on VPU.
    h = jnp.dot(x_ref[...], w1_ref[...], preferred_element_type=jnp.float32)
    h = jnp.maximum(h + b1_ref[...], 0.0)
    # dropout: eval-mode identity (see TODO above)
    # fc2: cast the activation back to bf16 so the second matmul is also bf16-native.
    y = jnp.dot(h.astype(w2_ref.dtype), w2_ref[...],
                preferred_element_type=jnp.float32)
    o_ref[...] = (y + b2_ref[...]).astype(o_ref.dtype)


def mlp_forward(x, w1, b1, w2, b2, *, block_b=512):
    """x: [B, 512] f32; w1: [512, 512]; b1: [1, 512]; w2: [512, 3]; b2: [1, 3]."""
    B, d_in = x.shape
    assert d_in == D_IN
    assert w1.shape == (D_IN, D_HID)
    assert w2.shape == (D_HID, D_OUT)

    # Batch tile: multiple of 16 rows (bf16 sublane packing), capped at block_b;
    # pad B up to a multiple of the tile so the BlockSpec divides evenly.
    tb = min(block_b, _round_up(max(B, 1), 16))
    b_pad = _round_up(B, tb)

    # Cast / pad operands for the kernel.
    x_p = jnp.zeros((b_pad, D_IN), jnp.bfloat16).at[:B].set(x.astype(jnp.bfloat16))
    w1_b = w1.astype(jnp.bfloat16)
    w2_p = jnp.zeros((D_HID, D_OUT_PAD), jnp.bfloat16).at[:, :D_OUT].set(
        w2.astype(jnp.bfloat16))
    b1_r = jnp.asarray(b1, jnp.float32).reshape(1, D_HID)
    b2_p = jnp.zeros((1, D_OUT_PAD), jnp.float32).at[:, :D_OUT].set(
        jnp.asarray(b2, jnp.float32).reshape(1, D_OUT))

    grid = (b_pad // tb,)

    bytes_accessed = (
        x_p.size * 2 + w1_b.size * 2 + w2_p.size * 2
        + b1_r.size * 4 + b2_p.size * 4 + b_pad * D_OUT_PAD * 4)
    cost = pl.CostEstimate(
        flops=2 * b_pad * D_HID * (D_IN + D_OUT_PAD),
        transcendentals=0,
        bytes_accessed=bytes_accessed)

    out_pad = pl.pallas_call(
        _mlp_kernel,
        out_shape=jax.ShapeDtypeStruct((b_pad, D_OUT_PAD), jnp.float32),
        grid_spec=pltpu.PrefetchScalarGridSpec(
            num_scalar_prefetch=0,
            grid=grid,
            in_specs=[
                pl.BlockSpec((tb, D_IN), lambda i: (i, 0)),        # x: batch-tiled
                pl.BlockSpec((D_IN, D_HID), lambda i: (0, 0)),     # w1: resident
                pl.BlockSpec((1, D_HID), lambda i: (0, 0)),        # b1: resident
                pl.BlockSpec((D_HID, D_OUT_PAD), lambda i: (0, 0)),# w2: resident
                pl.BlockSpec((1, D_OUT_PAD), lambda i: (0, 0)),    # b2: resident
            ],
            out_specs=pl.BlockSpec((tb, D_OUT_PAD), lambda i: (i, 0)),
        ),
        compiler_params=pltpu.CompilerParams(
            dimension_semantics=("parallel",),
        ),
        cost_estimate=cost,
    )(x_p, w1_b, b1_r, w2_p, b2_p)

    # Strip batch padding and the lane padding on the 3-wide fc2 output.
    return out_pad[:B, :D_OUT].astype(x.dtype)


def init_params(key):
    """Deterministic init mimicking nn.Linear default (uniform +/- 1/sqrt(fan_in))."""
    k1, k2, k3, k4 = jax.random.split(key, 4)
    bound1 = 1.0 / math.sqrt(D_IN)
    bound2 = 1.0 / math.sqrt(D_HID)
    # stored as [in, out] (transposed vs torch's [out, in])
    w1 = jax.random.uniform(k1, (D_IN, D_HID), jnp.float32, -bound1, bound1)
    b1 = jax.random.uniform(k2, (1, D_HID), jnp.float32, -bound1, bound1)
    w2 = jax.random.uniform(k3, (D_HID, D_OUT), jnp.float32, -bound2, bound2)
    b2 = jax.random.uniform(k4, (1, D_OUT), jnp.float32, -bound2, bound2)
    return w1, b1, w2, b2


if __name__ == "__main__":
    key = jax.random.PRNGKey(0)
    kx, kp = jax.random.split(key)

    B = 8
    x = jax.random.normal(kx, (B, D_IN), jnp.float32)
    w1, b1, w2, b2 = init_params(kp)

    out = mlp_forward(x, w1, b1, w2, b2)
    out = jax.block_until_ready(out)
    assert out.shape == (B, D_OUT)

    # Reference 1: full-f32 forward (loose tolerance; kernel uses bf16 operands).
    ref_f32 = jnp.maximum(x @ w1 + b1, 0.0) @ w2 + b2
    assert jnp.allclose(out, ref_f32, atol=3e-2, rtol=3e-2), (
        jnp.max(jnp.abs(out - ref_f32)))

    # Reference 2: same bf16 operand casts as the kernel (tight tolerance).
    xb = x.astype(jnp.bfloat16)
    h = jnp.maximum(
        jnp.dot(xb, w1.astype(jnp.bfloat16), preferred_element_type=jnp.float32)
        + b1, 0.0)
    ref_bf16 = jnp.dot(h.astype(jnp.bfloat16), w2.astype(jnp.bfloat16),
                       preferred_element_type=jnp.float32) + b2
    assert jnp.allclose(out, ref_bf16, atol=2e-3, rtol=2e-3), (
        jnp.max(jnp.abs(out - ref_bf16)))

    print("KERNEL_OK")
</pallas_src>

<mosaic_0001>
module attributes {stable_mosaic.version = 11 : i64} {
  func.func @_mlp_kernel(%arg0: i32, %arg1: memref<16x512xbf16, #tpu.memory_space<vmem>>, %arg2: memref<512x512xbf16, #tpu.memory_space<vmem>>, %arg3: memref<1x512xf32, #tpu.memory_space<vmem>>, %arg4: memref<512x128xbf16, #tpu.memory_space<vmem>>, %arg5: memref<1x128xf32, #tpu.memory_space<vmem>>, %arg6: memref<16x128xf32, #tpu.memory_space<vmem>>) attributes {dimension_semantics = [#tpu.dimension_semantics<parallel>], iteration_bounds = array<i64: 1>, scalar_prefetch = 0 : i64, scratch_operands = 0 : i64, tpu.core_type = #tpu.core_type<tc>, window_params = [{transform_indices = @transform_0, window_bounds = array<i64: 16, 512>}, {pipeline_mode = #tpu.pipeline_mode<synchronous>, transform_indices = @transform_1, window_bounds = array<i64: 512, 512>}, {pipeline_mode = #tpu.pipeline_mode<synchronous>, transform_indices = @transform_2, window_bounds = array<i64: 1, 512>}, {pipeline_mode = #tpu.pipeline_mode<synchronous>, transform_indices = @transform_3, window_bounds = array<i64: 512, 128>}, {pipeline_mode = #tpu.pipeline_mode<synchronous>, transform_indices = @transform_4, window_bounds = array<i64: 1, 128>}, {transform_indices = @transform_5, window_bounds = array<i64: 16, 128>}]} {
    %c0 = arith.constant 0 : index
    %c0_0 = arith.constant 0 : index
    %0 = vector.load %arg1[%c0, %c0_0] : memref<16x512xbf16, #tpu.memory_space<vmem>>, vector<16x512xbf16>
    %c0_1 = arith.constant 0 : index
    %c0_2 = arith.constant 0 : index
    %1 = vector.load %arg2[%c0_1, %c0_2] : memref<512x512xbf16, #tpu.memory_space<vmem>>, vector<512x512xbf16>
    %cst = arith.constant dense<0.000000e+00> : vector<16x512xf32>
    %2 = tpu.matmul %0, %1, %cst {dimension_numbers = #tpu.dot_dimension_numbers<[1], [0], [0], [1], [0, 0, 1, 1], [], []>} : vector<16x512xbf16>, vector<512x512xbf16>, vector<16x512xf32> -> vector<16x512xf32>
    %c0_3 = arith.constant 0 : index
    %c0_4 = arith.constant 0 : index
    %3 = vector.load %arg3[%c0_3, %c0_4] : memref<1x512xf32, #tpu.memory_space<vmem>>, vector<1x512xf32>
    %4 = vector.broadcast %3 : vector<1x512xf32> to vector<16x512xf32>
    %5 = arith.addf %2, %4 : vector<16x512xf32>
    %cst_5 = arith.constant 0.000000e+00 : f32
    %6 = vector.broadcast %cst_5 : f32 to vector<16x512xf32>
    %7 = arith.maximumf %5, %6 : vector<16x512xf32>
    %8 = arith.truncf %7 : vector<16x512xf32> to vector<16x512xbf16>
    %c0_6 = arith.constant 0 : index
    %c0_7 = arith.constant 0 : index
    %9 = vector.load %arg4[%c0_6, %c0_7] : memref<512x128xbf16, #tpu.memory_space<vmem>>, vector<512x128xbf16>
    %cst_8 = arith.constant dense<0.000000e+00> : vector<16x128xf32>
    %10 = tpu.matmul %8, %9, %cst_8 {dimension_numbers = #tpu.dot_dimension_numbers<[1], [0], [0], [1], [0, 0, 1, 1], [], []>} : vector<16x512xbf16>, vector<512x128xbf16>, vector<16x128xf32> -> vector<16x128xf32>
    %c0_9 = arith.constant 0 : index
    %c0_10 = arith.constant 0 : index
    %11 = vector.load %arg5[%c0_9, %c0_10] : memref<1x128xf32, #tpu.memory_space<vmem>>, vector<1x128xf32>
    %12 = vector.broadcast %11 : vector<1x128xf32> to vector<16x128xf32>
    %13 = arith.addf %10, %12 : vector<16x128xf32>
    %c0_11 = arith.constant 0 : index
    %c0_12 = arith.constant 0 : index
    %14 = vector.load %arg6[%c0_11, %c0_12] : memref<16x128xf32, #tpu.memory_space<vmem>>, vector<16x128xf32>
    tpu.vector_store %arg6[%c0_11, %c0_12], %13 {strides = array<i32>} : memref<16x128xf32, #tpu.memory_space<vmem>>, vector<16x128xf32>,
    return
  }
  func.func @transform_0(%arg0: i32) -> (i32, i32) {
    %c0_i32 = arith.constant 0 : i32
    %c0_i32_0 = arith.constant 0 : i32
    return %arg0, %c0_i32 : i32, i32
  }
  func.func @transform_1(%arg0: i32) -> (i32, i32) {
    %c0_i32 = arith.constant 0 : i32
    %c0_i32_0 = arith.constant 0 : i32
    %c0_i32_1 = arith.constant 0 : i32
    return %c0_i32, %c0_i32_0 : i32, i32
  }
  func.func @transform_2(%arg0: i32) -> (i32, i32) {
    %c0_i32 = arith.constant 0 : i32
    %c0_i32_0 = arith.constant 0 : i32
    %c0_i32_1 = arith.constant 0 : i32
    return %c0_i32, %c0_i32_0 : i32, i32
  }
  func.func @transform_3(%arg0: i32) -> (i32, i32) {
    %c0_i32 = arith.constant 0 : i32
    %c0_i32_0 = arith.constant 0 : i32
    %c0_i32_1 = arith.constant 0 : i32
    return %c0_i32, %c0_i32_0 : i32, i32
  }
  func.func @transform_4(%arg0: i32) -> (i32, i32) {
    %c0_i32 = arith.constant 0 : i32
    %c0_i32_0 = arith.constant 0 : i32
    %c0_i32_1 = arith.constant 0 : i32
    return %c0_i32, %c0_i32_0 : i32, i32
  }
  func.func @transform_5(%arg0: i32) -> (i32, i32) {
    %c0_i32 = arith.constant 0 : i32
    %c0_i32_0 = arith.constant 0 : i32
    return %arg0, %c0_i32 : i32, i32
  }
}

</mosaic_0001>

<bundles_post_ra>
// kernel: tpu_custom_call.1
= control target key start
LH: loop header
LB: loop body
LE: loop exit
PB: predicated region body
PF: predicated region fallthrough
CT: control target
= control target key end

     0   :  { %10 = vsyncpa [#allocation3], 0  ;;  %s2508_s0 = inlined_call_operand.hbm [shape: bf16[16,512], index: 0, kind: input, shape index: {}]   ;;  %s2509_s1 = inlined_call_operand.hbm [shape: bf16[512,512], index: 1, kind: input, shape index: {}]   ;;  %s2510_s2 = inlined_call_operand.hbm [shape: f32[1,512], index: 2, kind: input, shape index: {}]   ;;  %s2511_s3 = inlined_call_operand.hbm [shape: bf16[512,128], index: 3, kind: input, shape index: {}]   ;;  %s2512_s4 = inlined_call_operand.vmem [shape: f32[1,128], index: 4, kind: input, shape index: {}]   ;;  %s2513_s5 = inlined_call_operand.hbm [shape: f32[16,128], index: 5, kind: output, shape index: {}]  }
   0x1   :  { %11 = vsyncpa [#allocation6], 0 }
   0x2   :  { %12 = vsyncpa [#allocation9], 0 }
   0x3   :  { %13 = vsyncpa [#allocation4], 0  ;;  %s31_s20 = sshll.u32 %s2509_s1, 4  ;;  %s2419_s21 = smov [#allocation5]   ;;  %s32_s20 = int_to_ptr.hbm [resolvable:$true] %s31_s20 }
   0x4   :  { %s33_s22 = sshll.u32 %s2419_s21, 4  ;;  %s18_s25 = sshll.u32 %s2508_s0, 4  ;;  %s34_s22 = int_to_ptr.vmem [resolvable:$true] %s33_s22  ;;  %s19_s25 = int_to_ptr.hbm [resolvable:$true] %s18_s25 }
   0x5   :  { %s2420_s26 = smov 256   ;;  %s2421_s27 = smov 16  }
   0x6   :  { %39 = dma.hbm_to_vmem [thread:$0]  %s32_s20, 16384, %s34_s22, [#allocation6], %s2420_s26, %s2420_s26, %s2421_s27  }
   0x7   :  { %s2422_s28 = smov [#allocation2]   ;;  %s45_s7 = sshll.u32 %s2510_s2, 4  ;;  %s46_s7 = int_to_ptr.hbm [resolvable:$true] %s45_s7 }
   0x8   :  { %s20_s29 = sshll.u32 %s2422_s28, 4  ;;  %s55_s9 = sshll.u32 %s2511_s3, 4  ;;  %s21_s29 = int_to_ptr.vmem [resolvable:$true] %s20_s29  ;;  %s56_s9 = int_to_ptr.hbm [resolvable:$true] %s55_s9 }
   0x9   :  { %26 = dma.hbm_to_vmem [thread:$0]  %s19_s25, 512, %s21_s29, [#allocation3], %s2420_s26, %s2420_s26, %s2421_s27  }
   0xa   :  { %s2423_s10 = smov [#allocation7]   ;;  %s2424_s0 = smov [#allocation8]  }
   0xb   :  { %s47_s11 = sshll.u32 %s2423_s10, 4  ;;  %s57_s12 = sshll.u32 %s2424_s0, 4  ;;  %s48_s11 = int_to_ptr.vmem [resolvable:$true] %s47_s11  ;;  %s58_s12 = int_to_ptr.vmem [resolvable:$true] %s57_s12 }
   0xc   :  { %50 = dma.hbm_to_vmem [thread:$0]  %s46_s7, 64, %s48_s11, [#allocation6]  }
   0xd   :  { %s2425_s13 = smov 64   ;;  %s2426_s14 = smov 4  }
   0xe   :  { %63 = dma.hbm_to_vmem [thread:$0]  %s56_s9, 4096, %s58_s12, [#allocation9], %s2425_s13, %s2425_s13, %s2426_s14  }
   0xf   :  { %2411 = dma.done.wait [#allocation3], 512  }
  0x10   :  { %2412 = vsyncadd [#allocation3], 4294966784 }
  0x11   :  { %2413 = dma.done.wait [#allocation6], 16448  }
  0x12   :  { %2414 = vsyncadd [#allocation6], 4294950848 }
  0x13   :  { %2415 = dma.done.wait [#allocation9], 4096  }
  0x14   :  { %2416 = vsyncadd [#allocation9], 4294963200  ;;  %v1589_v0 = vld [vmem:[#allocation5 + $0xe0] sm:$0xf]  ;;  %v2149_v1 = vld [vmem:[#allocation5 + $0xec] sm:$0xf0] }
  0x15   :  { %v1717_v2 = vld [vmem:[#allocation5 + $0x1e0] sm:$0xf]  ;;  %v1590_v3 = vor.u32 %v2149_v1, %v1589_v0  ;;  %v2181_v4 = vld [vmem:[#allocation5 + $0x1ec] sm:$0xf0]  ;;  %s2427_s15 = smov [#allocation10]   ;;  %s1444_s19 = sshll.u32 %s2513_s5, 4  ;;  %s1445_s19 = int_to_ptr.hbm [resolvable:$true] %s1444_s19 }
  0x16   :  { %v1845_v5 = vld [vmem:[#allocation5 + $0x2e0] sm:$0xf]  ;;  %v2213_v6 = vld [vmem:[#allocation5 + $0x2ec] sm:$0xf0]  ;;  %v1718_v7 = vor.u32 %v2181_v4, %v1717_v2  ;;  %s1442_s16 = sshll.u32 %s2427_s15, 4  ;;  %s2429_s20 = smov 8   ;;  %s1443_s16 = int_to_ptr.vmem [resolvable:$true] %s1442_s16 }
  0x17   :  { %v1846_v8 = vor.u32 %v2213_v6, %v1845_v5  ;;  %v1973_v9 = vld [vmem:[#allocation5 + $0x3e0] sm:$0xf]  ;;  %v2245_v10 = vld [vmem:[#allocation5 + $0x3ec] sm:$0xf0]  ;;  %884 = vmatpush.bf16.msra.mxu0 %v1590_v3 }
  0x18   :  { %v1573_v11 = vld [vmem:[#allocation5 + $0xc0] sm:$0xf]  ;;  %v1974_v12 = vor.u32 %v2245_v10, %v1973_v9  ;;  %v2145_v13 = vld [vmem:[#allocation5 + $0xcc] sm:$0xf0]  ;;  %898 = vmatpush.bf16.msra.mxu1 %v1718_v7 }
  0x19   :  { %v1701_v14 = vld [vmem:[#allocation5 + $0x1c0] sm:$0xf]  ;;  %v2177_v15 = vld [vmem:[#allocation5 + $0x1cc] sm:$0xf0]  ;;  %912 = vmatpush.bf16.msra.mxu2 %v1846_v8  ;;  %v1574_v16 = vor.u32 %v2145_v13, %v1573_v11 }
  0x1a   :  { %v1702_v17 = vor.u32 %v2177_v15, %v1701_v14  ;;  %v1829_v18 = vld [vmem:[#allocation5 + $0x2c0] sm:$0xf]  ;;  %v2209_v19 = vld [vmem:[#allocation5 + $0x2cc] sm:$0xf0]  ;;  %926 = vmatpush.bf16.msra.mxu3 %v1974_v12 }
  0x1b   :  { %v1957_v20 = vld [vmem:[#allocation5 + $0x3c0] sm:$0xf]  ;;  %v1830_v21 = vor.u32 %v2209_v19, %v1829_v18  ;;  %v2241_v22 = vld [vmem:[#allocation5 + $0x3cc] sm:$0xf0]  ;;  %885 = vmatpush.bf16.msra.mxu0 %v1574_v16 }
  0x1c   :  { %v1557_v23 = vld [vmem:[#allocation5 + $0xa0] sm:$0xf]  ;;  %v2141_v24 = vld [vmem:[#allocation5 + $0xac] sm:$0xf0]  ;;  %v1958_v25 = vor.u32 %v2241_v22, %v1957_v20  ;;  %899 = vmatpush.bf16.msra.mxu1 %v1702_v17 }
  0x1d   :  { %v1685_v26 = vld [vmem:[#allocation5 + $0x1a0] sm:$0xf]  ;;  %v2173_v27 = vld [vmem:[#allocation5 + $0x1ac] sm:$0xf0]  ;;  %v1558_v29 = vor.u32 %v2141_v24, %v1557_v23  ;;  %913 = vmatpush.bf16.msra.mxu2 %v1830_v21 }
  0x1e   :  { %v1813_v28 = vld [vmem:[#allocation5 + $0x2a0] sm:$0xf]  ;;  %v2205_v30 = vld [vmem:[#allocation5 + $0x2ac] sm:$0xf0]  ;;  %v1686_v33 = vor.u32 %v2173_v27, %v1685_v26  ;;  %927 = vmatpush.bf16.msra.mxu3 %v1958_v25 }
  0x1f   :  { %v1941_v31 = vld [vmem:[#allocation5 + $0x3a0] sm:$0xf]  ;;  %v2237_v32 = vld [vmem:[#allocation5 + $0x3ac] sm:$0xf0]  ;;  %v1814_v34 = vor.u32 %v2205_v30, %v1813_v28  ;;  %886 = vmatpush.bf16.msra.mxu0 %v1558_v29  ;;  %v2147_v28 = vld [vmem:[#allocation5 + $0xe4] sm:$0xf] }
  0x20   :  { %v1541_v35 = vld [vmem:[#allocation5 + $0x80] sm:$0xf]  ;;  %v2137_v36 = vld [vmem:[#allocation5 + $0x8c] sm:$0xf0]  ;;  %v1942_v38 = vor.u32 %v2237_v32, %v1941_v31  ;;  %900 = vmatpush.bf16.msra.mxu1 %v1686_v33  ;;  %v1591_v29 = vld [vmem:[#allocation5 + $0xf0] sm:$0xf0] }
  0x21   :  { %v1669_v37 = vld [vmem:[#allocation5 + $0x180] sm:$0xf]  ;;  %v2169_v39 = vld [vmem:[#allocation5 + $0x18c] sm:$0xf0]  ;;  %v1542_v44 = vor.u32 %v2137_v36, %v1541_v35  ;;  %914 = vmatpush.bf16.msra.mxu2 %v1814_v34  ;;  %v2179_v30 = vld [vmem:[#allocation5 + $0x1e4] sm:$0xf] }
  0x22   :  { %v1797_v40 = vld [vmem:[#allocation5 + $0x280] sm:$0xf]  ;;  %v2201_v41 = vld [vmem:[#allocation5 + $0x28c] sm:$0xf0]  ;;  %v1670_v45 = vor.u32 %v2169_v39, %v1669_v37  ;;  %928 = vmatpush.bf16.msra.mxu3 %v1942_v38  ;;  %v1719_v32 = vld [vmem:[#allocation5 + $0x1f0] sm:$0xf0] }
  0x23   :  { %v1925_v42 = vld [vmem:[#allocation5 + $0x380] sm:$0xf]  ;;  %v2233_v43 = vld [vmem:[#allocation5 + $0x38c] sm:$0xf0]  ;;  %v1798_v46 = vor.u32 %v2201_v41, %v1797_v40  ;;  %887 = vmatpush.bf16.msra.mxu0 %v1542_v44  ;;  %v2211_v33 = vld [vmem:[#allocation5 + $0x2e4] sm:$0xf]  ;;  %v1594_v40 = vor.u32 %v2147_v28, %v1591_v29 }
  0x24   :  { %v1525_v47 = vld [vmem:[#allocation5 + $0x60] sm:$0xf]  ;;  %v2133_v48 = vld [vmem:[#allocation5 + $0x6c] sm:$0xf0]  ;;  %v1926_v50 = vor.u32 %v2233_v43, %v1925_v42  ;;  %901 = vmatpush.bf16.msra.mxu1 %v1670_v45  ;;  %v1847_v34 = vld [vmem:[#allocation5 + $0x2f0] sm:$0xf0]  ;;  %v1722_v43 = vor.u32 %v2179_v30, %v1719_v32 }
  0x25   :  { %v1653_v49 = vld [vmem:[#allocation5 + $0x160] sm:$0xf]  ;;  %v2165_v51 = vld [vmem:[#allocation5 + $0x16c] sm:$0xf0]  ;;  %v1526_v56 = vor.u32 %v2133_v48, %v1525_v47  ;;  %915 = vmatpush.bf16.msra.mxu2 %v1798_v46  ;;  %v2243_v37 = vld [vmem:[#allocation5 + $0x3e4] sm:$0xf]  ;;  %v1850_v44 = vor.u32 %v2211_v33, %v1847_v34 }
  0x26   :  { %v1781_v52 = vld [vmem:[#allocation5 + $0x260] sm:$0xf]  ;;  %v2197_v53 = vld [vmem:[#allocation5 + $0x26c] sm:$0xf0]  ;;  %v1654_v57 = vor.u32 %v2165_v51, %v1653_v49  ;;  %929 = vmatpush.bf16.msra.mxu3 %v1926_v50  ;;  %v1975_v38 = vld [vmem:[#allocation5 + $0x3f0] sm:$0xf0] }
  0x27   :  { %v1909_v54 = vld [vmem:[#allocation5 + $0x360] sm:$0xf]  ;;  %v2229_v55 = vld [vmem:[#allocation5 + $0x36c] sm:$0xf0]  ;;  %v1782_v58 = vor.u32 %v2197_v53, %v1781_v52  ;;  %888 = vmatpush.bf16.msra.mxu0 %v1526_v56  ;;  %v2143_v41 = vld [vmem:[#allocation5 + $0xc4] sm:$0xf]  ;;  %v1978_v48 = vor.u32 %v2243_v37, %v1975_v38 }
  0x28   :  { %v1509_v59 = vld [vmem:[#allocation5 + $0x40] sm:$0xf]  ;;  %v2129_v60 = vld [vmem:[#allocation5 + $0x4c] sm:$0xf0]  ;;  %v1910_v62 = vor.u32 %v2229_v55, %v1909_v54  ;;  %902 = vmatpush.bf16.msra.mxu1 %v1654_v57  ;;  %v1575_v42 = vld [vmem:[#allocation5 + $0xd0] sm:$0xf0] }
  0x29   :  { %v1637_v61 = vld [vmem:[#allocation5 + $0x140] sm:$0xf]  ;;  %v2161_v63 = vld [vmem:[#allocation5 + $0x14c] sm:$0xf0]  ;;  %v1510_v4 = vor.u32 %v2129_v60, %v1509_v59  ;;  %916 = vmatpush.bf16.msra.mxu2 %v1782_v58  ;;  %v2175_v45 = vld [vmem:[#allocation5 + $0x1c4] sm:$0xf]  ;;  %v1578_v55 = vor.u32 %v2143_v41, %v1575_v42 }
  0x2a   :  { %v1765_v0 = vld [vmem:[#allocation5 + $0x240] sm:$0xf]  ;;  %v2193_v1 = vld [vmem:[#allocation5 + $0x24c] sm:$0xf0]  ;;  %v1638_v5 = vor.u32 %v2161_v63, %v1637_v61  ;;  %930 = vmatpush.bf16.msra.mxu3 %v1910_v62  ;;  %v1703_v46 = vld [vmem:[#allocation5 + $0x1d0] sm:$0xf0] }
  0x2b   :  { %v1893_v2 = vld [vmem:[#allocation5 + $0x340] sm:$0xf]  ;;  %v2225_v3 = vld [vmem:[#allocation5 + $0x34c] sm:$0xf0]  ;;  %v1766_v6 = vor.u32 %v2193_v1, %v1765_v0  ;;  %889 = vmatpush.bf16.msra.mxu0 %v1510_v4  ;;  %v2207_v47 = vld [vmem:[#allocation5 + $0x2c4] sm:$0xf]  ;;  %v1706_v56 = vor.u32 %v2175_v45, %v1703_v46 }
  0x2c   :  { %v1493_v7 = vld [vmem:[#allocation5 + $0x20] sm:$0xf]  ;;  %v2125_v8 = vld [vmem:[#allocation5 + $0x2c] sm:$0xf0]  ;;  %v1894_v10 = vor.u32 %v2225_v3, %v1893_v2  ;;  %903 = vmatpush.bf16.msra.mxu1 %v1638_v5  ;;  %v1831_v49 = vld [vmem:[#allocation5 + $0x2d0] sm:$0xf0] }
  0x2d   :  { %v1621_v9 = vld [vmem:[#allocation5 + $0x120] sm:$0xf]  ;;  %v2157_v11 = vld [vmem:[#allocation5 + $0x12c] sm:$0xf0]  ;;  %v1494_v16 = vor.u32 %v2125_v8, %v1493_v7  ;;  %917 = vmatpush.bf16.msra.mxu2 %v1766_v6  ;;  %v2239_v50 = vld [vmem:[#allocation5 + $0x3c4] sm:$0xf]  ;;  %v1834_v61 = vor.u32 %v2207_v47, %v1831_v49 }
  0x2e   :  { %v1749_v12 = vld [vmem:[#allocation5 + $0x220] sm:$0xf]  ;;  %v2189_v13 = vld [vmem:[#allocation5 + $0x22c] sm:$0xf0]  ;;  %v1622_v19 = vor.u32 %v2157_v11, %v1621_v9  ;;  %931 = vmatpush.bf16.msra.mxu3 %v1894_v10  ;;  %v1959_v51 = vld [vmem:[#allocation5 + $0x3d0] sm:$0xf0] }
  0x2f   :  { %v1877_v14 = vld [vmem:[#allocation5 + $0x320] sm:$0xf]  ;;  %v2221_v15 = vld [vmem:[#allocation5 + $0x32c] sm:$0xf0]  ;;  %v1750_v20 = vor.u32 %v2189_v13, %v1749_v12  ;;  %890 = vmatpush.bf16.msra.mxu0 %v1494_v16  ;;  %v1469_v52 = vld [vmem:[#allocation2 + $0x8] sm:$0xf]  ;;  %v1962_v3 = vor.u32 %v2239_v50, %v1959_v51 }
  0x30   :  { %v1477_v17 = vld [vmem:[#allocation5] sm:$0xf]  ;;  %v2121_v18 = vld [vmem:[#allocation5 + $0xc] sm:$0xf0]  ;;  %v1878_v24 = vor.u32 %v2221_v15, %v1877_v14  ;;  %904 = vmatpush.bf16.msra.mxu1 %v1622_v19  ;;  %v2118_v53 = vld [vmem:[#allocation2 + $0x14] sm:$0xf0] }
  0x31   :  { %v1605_v21 = vld [vmem:[#allocation5 + $0x100] sm:$0xf]  ;;  %v2153_v22 = vld [vmem:[#allocation5 + $0x10c] sm:$0xf0]  ;;  %v1478_v31 = vor.u32 %v2121_v18, %v1477_v17  ;;  %918 = vmatpush.bf16.msra.mxu2 %v1750_v20  ;;  %v2472_v57 = vor.u32 %v2118_v53, %v1469_v52  ;;  %v2116_v59 = vld [vmem:[#allocation2 + $0xc] sm:$0xf] }
  0x32   :  { %v1733_v23 = vld [vmem:[#allocation5 + $0x200] sm:$0xf]  ;;  %v2185_v25 = vld [vmem:[#allocation5 + $0x20c] sm:$0xf0]  ;;  %v1606_v35 = vor.u32 %v2153_v22, %v1605_v21  ;;  %932 = vmatpush.bf16.msra.mxu3 %v1878_v24  ;;  %v1471_v60 = vld [vmem:[#allocation2 + $0x18] sm:$0xf0] }
  0x33   :  { %v1861_v26 = vld [vmem:[#allocation5 + $0x300] sm:$0xf]  ;;  %v2217_v27 = vld [vmem:[#allocation5 + $0x30c] sm:$0xf0]  ;;  %v1734_v36 = vor.u32 %v2185_v25, %v1733_v23  ;;  %891 = vmatpush.bf16.msra.mxu0 %v1478_v31  ;;  %v2139_v62 = vld [vmem:[#allocation5 + $0xa4] sm:$0xf]  ;;  %v2476_v2 = vor.u32 %v2116_v59, %v1471_v60 }
  0x34   :  { %v1862_v39 = vor.u32 %v2217_v27, %v1861_v26  ;;  %905 = vmatpush.bf16.msra.mxu1 %v1606_v35  ;;  %v1461_v54 = vld [vmem:[#allocation2] sm:$0xf]  ;;  %v2117_v58 = vld [vmem:[#allocation2 + $0xc] sm:$0xf0]  ;;  %v1559_v63 = vld [vmem:[#allocation5 + $0xb0] sm:$0xf0] }
  0x35   :  { %919 = vmatpush.bf16.msra.mxu2 %v1734_v36  ;;  %v2171_v0 = vld [vmem:[#allocation5 + $0x1a4] sm:$0xf]  ;;  %v2474_v1 = vor.u32 %v2117_v58, %v1461_v54  ;;  %v1687_v4 = vld [vmem:[#allocation5 + $0x1b0] sm:$0xf0]  ;;  %v1562_v10 = vor.u32 %v2139_v62, %v1559_v63 }
  0x36   :  { %933 = vmatpush.bf16.msra.mxu3 %v1862_v39  ;;  %v2203_v5 = vld [vmem:[#allocation5 + $0x2a4] sm:$0xf]  ;;  %v1815_v6 = vld [vmem:[#allocation5 + $0x2b0] sm:$0xf0]  ;;  %v1690_v12 = vor.u32 %v2171_v0, %v1687_v4 }
  0x37   :  { %940 = vmatpush.bf16.msrb.mxu0 %v1594_v40  ;;  %v2235_v7 = vld [vmem:[#allocation5 + $0x3a4] sm:$0xf]  ;;  %v1943_v8 = vld [vmem:[#allocation5 + $0x3b0] sm:$0xf0]  ;;  %v1818_v13 = vor.u32 %v2203_v5, %v1815_v6 }
  0x38   :  { %954 = vmatpush.bf16.msrb.mxu1 %v1722_v43  ;;  %920 = vmatmul.bf16.vlgmr.msra.gmra.mxu2 %v2472_v57  ;;  %v2115_v9 = vld [vmem:[#allocation2 + $0x4] sm:$0xf]  ;;  %v1463_v11 = vld [vmem:[#allocation2 + $0x10] sm:$0xf0]  ;;  %v1946_v18 = vor.u32 %v2235_v7, %v1943_v8 }
  0x39   :  { %968 = vmatpush.bf16.msrb.mxu2 %v1850_v44  ;;  %892 = vmatmul.bf16.vlgmr.msra.gmra.mxu0 %v2474_v1  ;;  %v2135_v14 = vld [vmem:[#allocation5 + $0x84] sm:$0xf]  ;;  %v1543_v15 = vld [vmem:[#allocation5 + $0x90] sm:$0xf0]  ;;  %v2481_v17 = vor.u32 %v2115_v9, %v1463_v11  ;;  %v1597_v11 = vld [vmem:[#allocation5 + $0xe8] sm:$0xf] }
  0x3a   :  { %982 = vmatpush.bf16.msrb.mxu3 %v1978_v48  ;;  %v2167_v16 = vld [vmem:[#allocation5 + $0x184] sm:$0xf]  ;;  %v1671_v19 = vld [vmem:[#allocation5 + $0x190] sm:$0xf0]  ;;  %v1546_v24 = vor.u32 %v2135_v14, %v1543_v15  ;;  %v2182_v15 = vld [vmem:[#allocation5 + $0x1f4] sm:$0xf0] }
  0x3b   :  { %934 = vmatmul.bf16.vlgmr.msra.gmra.mxu3 %v2476_v2  ;;  %941 = vmatpush.bf16.msrb.mxu0 %v1578_v55  ;;  %v2199_v20 = vld [vmem:[#allocation5 + $0x284] sm:$0xf]  ;;  %v1799_v21 = vld [vmem:[#allocation5 + $0x290] sm:$0xf0]  ;;  %v1674_v25 = vor.u32 %v2167_v16, %v1671_v19  ;;  %v1853_v16 = vld [vmem:[#allocation5 + $0x2e8] sm:$0xf] }
  0x3c   :  { %955 = vmatpush.bf16.msrb.mxu1 %v1706_v56  ;;  %v2231_v22 = vld [vmem:[#allocation5 + $0x384] sm:$0xf]  ;;  %v1927_v23 = vld [vmem:[#allocation5 + $0x390] sm:$0xf0]  ;;  %v1802_v26 = vor.u32 %v2199_v20, %v1799_v21  ;;  %v1981_v21 = vld [vmem:[#allocation5 + $0x3e8] sm:$0xf] }
  0x3d   :  { %969 = vmatpush.bf16.msrb.mxu2 %v1834_v61  ;;  %906 = vmatmul.bf16.vlgmr.msra.gmra.mxu1 %v2481_v17  ;;  %v2131_v27 = vld [vmem:[#allocation5 + $0x64] sm:$0xf]  ;;  %v1527_v28 = vld [vmem:[#allocation5 + $0x70] sm:$0xf0]  ;;  %v1930_v30 = vor.u32 %v2231_v22, %v1927_v23  ;;  %v2246_v22 = vld [vmem:[#allocation5 + $0x3f4] sm:$0xf0] }
  0x3e   :  { %983 = vmatpush.bf16.msrb.mxu3 %v1962_v3  ;;  %v2163_v29 = vld [vmem:[#allocation5 + $0x164] sm:$0xf]  ;;  %v1655_v31 = vld [vmem:[#allocation5 + $0x170] sm:$0xf0]  ;;  %v1530_v36 = vor.u32 %v2131_v27, %v1527_v28  ;;  %v1581_v27 = vld [vmem:[#allocation5 + $0xc8] sm:$0xf] }
  0x3f   :  { %942 = vmatpush.bf16.msrb.mxu0 %v1562_v10  ;;  %v2195_v32 = vld [vmem:[#allocation5 + $0x264] sm:$0xf]  ;;  %v1783_v33 = vld [vmem:[#allocation5 + $0x270] sm:$0xf0]  ;;  %v1658_v37 = vor.u32 %v2163_v29, %v1655_v31  ;;  %v2146_v28 = vld [vmem:[#allocation5 + $0xd4] sm:$0xf0] }
  0x40   :  { %956 = vmatpush.bf16.msrb.mxu1 %v1690_v12  ;;  %v2227_v34 = vld [vmem:[#allocation5 + $0x364] sm:$0xf]  ;;  %v1911_v35 = vld [vmem:[#allocation5 + $0x370] sm:$0xf0]  ;;  %v1786_v38 = vor.u32 %v2195_v32, %v1783_v33  ;;  %v2150_v12 = vld [vmem:[#allocation5 + $0xf4] sm:$0xf0] }
  0x41   :  { %970 = vmatpush.bf16.msrb.mxu2 %v1818_v13  ;;  %v2127_v39 = vld [vmem:[#allocation5 + $0x44] sm:$0xf]  ;;  %v1511_v40 = vld [vmem:[#allocation5 + $0x50] sm:$0xf0]  ;;  %v1914_v42 = vor.u32 %v2227_v34, %v1911_v35  ;;  %v1725_v13 = vld [vmem:[#allocation5 + $0x1e8] sm:$0xf] }
  0x42   :  { %984 = vmatpush.bf16.msrb.mxu3 %v1946_v18  ;;  %v2159_v41 = vld [vmem:[#allocation5 + $0x144] sm:$0xf]  ;;  %v1639_v43 = vld [vmem:[#allocation5 + $0x150] sm:$0xf0]  ;;  %v1514_v48 = vor.u32 %v2127_v39, %v1511_v40  ;;  %v2214_v18 = vld [vmem:[#allocation5 + $0x2f4] sm:$0xf0] }
  0x43   :  { %943 = vmatpush.bf16.msrb.mxu0 %v1546_v24  ;;  %v2191_v44 = vld [vmem:[#allocation5 + $0x244] sm:$0xf]  ;;  %v1767_v45 = vld [vmem:[#allocation5 + $0x250] sm:$0xf0]  ;;  %v1642_v49 = vor.u32 %v2159_v41, %v1639_v43  ;;  %v1598_v24 = vor.u32 %v2150_v12, %v1597_v11  ;;  %v1709_v29 = vld [vmem:[#allocation5 + $0x1c8] sm:$0xf] }
  0x44   :  { %957 = vmatpush.bf16.msrb.mxu1 %v1674_v25  ;;  %v2223_v46 = vld [vmem:[#allocation5 + $0x344] sm:$0xf]  ;;  %v1895_v47 = vld [vmem:[#allocation5 + $0x350] sm:$0xf0]  ;;  %v1770_v50 = vor.u32 %v2191_v44, %v1767_v45  ;;  %v1726_v25 = vor.u32 %v2182_v15, %v1725_v13  ;;  %v2178_v31 = vld [vmem:[#allocation5 + $0x1d4] sm:$0xf0] }
  0x45   :  { %971 = vmatpush.bf16.msrb.mxu2 %v1802_v26  ;;  %v2123_v51 = vld [vmem:[#allocation5 + $0x24] sm:$0xf]  ;;  %v1495_v52 = vld [vmem:[#allocation5 + $0x30] sm:$0xf0]  ;;  %v1898_v54 = vor.u32 %v2223_v46, %v1895_v47  ;;  %v1854_v26 = vor.u32 %v2214_v18, %v1853_v16  ;;  %v1837_v32 = vld [vmem:[#allocation5 + $0x2c8] sm:$0xf] }
  0x46   :  { %985 = vmatpush.bf16.msrb.mxu3 %v1930_v30  ;;  %v2155_v53 = vld [vmem:[#allocation5 + $0x124] sm:$0xf]  ;;  %v1623_v55 = vld [vmem:[#allocation5 + $0x130] sm:$0xf0]  ;;  %v1498_v61 = vor.u32 %v2123_v51, %v1495_v52  ;;  %v1982_v30 = vor.u32 %v2246_v22, %v1981_v21  ;;  %v2210_v33 = vld [vmem:[#allocation5 + $0x2d4] sm:$0xf0] }
  0x47   :  { %944 = vmatpush.bf16.msrb.mxu0 %v1530_v36  ;;  %v2187_v56 = vld [vmem:[#allocation5 + $0x224] sm:$0xf]  ;;  %v1751_v58 = vld [vmem:[#allocation5 + $0x230] sm:$0xf0]  ;;  %v1626_v0 = vor.u32 %v2155_v53, %v1623_v55  ;;  %v1965_v34 = vld [vmem:[#allocation5 + $0x3c8] sm:$0xf]  ;;  %v1582_v36 = vor.u32 %v2146_v28, %v1581_v27 }
  0x48   :  { %958 = vmatpush.bf16.msrb.mxu1 %v1658_v37  ;;  %v2219_v59 = vld [vmem:[#allocation5 + $0x324] sm:$0xf]  ;;  %v1879_v60 = vld [vmem:[#allocation5 + $0x330] sm:$0xf0]  ;;  %v1754_v3 = vor.u32 %v2187_v56, %v1751_v58  ;;  %v2242_v35 = vld [vmem:[#allocation5 + $0x3d4] sm:$0xf0]  ;;  %v1710_v37 = vor.u32 %v2178_v31, %v1709_v29 }
  0x49   :  { %972 = vmatpush.bf16.msrb.mxu2 %v1786_v38  ;;  %v2119_v62 = vld [vmem:[#allocation5 + $0x4] sm:$0xf]  ;;  %v1479_v63 = vld [vmem:[#allocation5 + $0x10] sm:$0xf0]  ;;  %v1882_v7 = vor.u32 %v2219_v59, %v1879_v60  ;;  %v1838_v38 = vor.u32 %v2210_v33, %v1837_v32  ;;  %v1565_v39 = vld [vmem:[#allocation5 + $0xa8] sm:$0xf] }
  0x4a   :  { %986 = vmatpush.bf16.msrb.mxu3 %v1914_v42  ;;  %v2151_v4 = vld [vmem:[#allocation5 + $0x104] sm:$0xf]  ;;  %v1607_v5 = vld [vmem:[#allocation5 + $0x110] sm:$0xf0]  ;;  %v1482_v14 = vor.u32 %v2119_v62, %v1479_v63  ;;  %v2142_v40 = vld [vmem:[#allocation5 + $0xb4] sm:$0xf0]  ;;  %v1966_v42 = vor.u32 %v2242_v35, %v1965_v34 }
  0x4b   :  { %945 = vmatpush.bf16.msrb.mxu0 %v1514_v48  ;;  %v2183_v6 = vld [vmem:[#allocation5 + $0x204] sm:$0xf]  ;;  %v1735_v8 = vld [vmem:[#allocation5 + $0x210] sm:$0xf0]  ;;  %v1610_v19 = vor.u32 %v2151_v4, %v1607_v5  ;;  %v1693_v41 = vld [vmem:[#allocation5 + $0x1a8] sm:$0xf]  ;;  %v1566_v48 = vor.u32 %v2142_v40, %v1565_v39 }
  0x4c   :  { %959 = vmatpush.bf16.msrb.mxu1 %v1642_v49  ;;  %v2215_v9 = vld [vmem:[#allocation5 + $0x304] sm:$0xf]  ;;  %v1863_v10 = vld [vmem:[#allocation5 + $0x310] sm:$0xf0]  ;;  %v1738_v20 = vor.u32 %v2183_v6, %v1735_v8  ;;  %v2174_v43 = vld [vmem:[#allocation5 + $0x1b4] sm:$0xf0] }
  0x4d   :  { %973 = vmatpush.bf16.msrb.mxu2 %v1770_v50  ;;  %v1866_v23 = vor.u32 %v2215_v9, %v1863_v10  ;;  %v1821_v44 = vld [vmem:[#allocation5 + $0x2a8] sm:$0xf]  ;;  %v2206_v45 = vld [vmem:[#allocation5 + $0x2b4] sm:$0xf0]  ;;  %v1694_v49 = vor.u32 %v2174_v43, %v1693_v41 }
  0x4e   :  { %987 = vmatpush.bf16.msrb.mxu3 %v1898_v54  ;;  %v1949_v46 = vld [vmem:[#allocation5 + $0x3a8] sm:$0xf]  ;;  %v2238_v47 = vld [vmem:[#allocation5 + $0x3b4] sm:$0xf0]  ;;  %v1822_v50 = vor.u32 %v2206_v45, %v1821_v44 }
  0x4f   :  { %946 = vmatpush.bf16.msrb.mxu0 %v1498_v61  ;;  %v1549_v51 = vld [vmem:[#allocation5 + $0x88] sm:$0xf]  ;;  %v2138_v52 = vld [vmem:[#allocation5 + $0x94] sm:$0xf0]  ;;  %v1950_v54 = vor.u32 %v2238_v47, %v1949_v46 }
  0x50   :  { %960 = vmatpush.bf16.msrb.mxu1 %v1626_v0  ;;  %v1677_v53 = vld [vmem:[#allocation5 + $0x188] sm:$0xf]  ;;  %v2170_v55 = vld [vmem:[#allocation5 + $0x194] sm:$0xf0]  ;;  %v1550_v61 = vor.u32 %v2138_v52, %v1549_v51  ;;  %v1727_v52 = vld [vmem:[#allocation5 + $0x1f8] sm:$0xf0] }
  0x51   :  { %974 = vmatpush.bf16.msrb.mxu2 %v1754_v3  ;;  %v1805_v56 = vld [vmem:[#allocation5 + $0x288] sm:$0xf]  ;;  %v2202_v58 = vld [vmem:[#allocation5 + $0x294] sm:$0xf0]  ;;  %v1678_v62 = vor.u32 %v2170_v55, %v1677_v53  ;;  %v2212_v53 = vld [vmem:[#allocation5 + $0x2ec] sm:$0xf] }
  0x52   :  { %988 = vmatpush.bf16.msrb.mxu3 %v1882_v7  ;;  %v1933_v59 = vld [vmem:[#allocation5 + $0x388] sm:$0xf]  ;;  %v2234_v60 = vld [vmem:[#allocation5 + $0x394] sm:$0xf0]  ;;  %v1806_v63 = vor.u32 %v2202_v58, %v1805_v56  ;;  %v2244_v58 = vld [vmem:[#allocation5 + $0x3ec] sm:$0xf] }
  0x53   :  { %947 = vmatpush.bf16.msrb.mxu0 %v1482_v14  ;;  %v1533_v0 = vld [vmem:[#allocation5 + $0x68] sm:$0xf]  ;;  %v2134_v3 = vld [vmem:[#allocation5 + $0x74] sm:$0xf0]  ;;  %v1934_v5 = vor.u32 %v2234_v60, %v1933_v59  ;;  %v1983_v59 = vld [vmem:[#allocation5 + $0x3f8] sm:$0xf0] }
  0x54   :  { %961 = vmatpush.bf16.msrb.mxu1 %v1610_v19  ;;  %v1661_v4 = vld [vmem:[#allocation5 + $0x168] sm:$0xf]  ;;  %v2166_v6 = vld [vmem:[#allocation5 + $0x174] sm:$0xf0]  ;;  %v1534_v11 = vor.u32 %v2134_v3, %v1533_v0  ;;  %v2144_v0 = vld [vmem:[#allocation5 + $0xcc] sm:$0xf] }
  0x55   :  { %975 = vmatpush.bf16.msrb.mxu2 %v1738_v20  ;;  %v1789_v7 = vld [vmem:[#allocation5 + $0x268] sm:$0xf]  ;;  %v2198_v8 = vld [vmem:[#allocation5 + $0x274] sm:$0xf0]  ;;  %v1662_v12 = vor.u32 %v2166_v6, %v1661_v4  ;;  %v1583_v3 = vld [vmem:[#allocation5 + $0xd8] sm:$0xf0] }
  0x56   :  { %989 = vmatpush.bf16.msrb.mxu3 %v1866_v23  ;;  %948 = vmatmul.bf16.vlgmr.msrb.gmra.mxu0 %v2474_v1  ;;  %v1917_v9 = vld [vmem:[#allocation5 + $0x368] sm:$0xf]  ;;  %v2230_v10 = vld [vmem:[#allocation5 + $0x374] sm:$0xf0]  ;;  %v1790_v13 = vor.u32 %v2198_v8, %v1789_v7  ;;  %v2176_v4 = vld [vmem:[#allocation5 + $0x1cc] sm:$0xf] }
  0x57   :  { %996 = vmatpush.bf16.msra.mxu0 %v1598_v24  ;;  %962 = vmatmul.bf16.vlgmr.msrb.gmra.mxu1 %v2481_v17  ;;  %v1517_v14 = vld [vmem:[#allocation5 + $0x48] sm:$0xf]  ;;  %v2130_v15 = vld [vmem:[#allocation5 + $0x54] sm:$0xf0]  ;;  %v1918_v18 = vor.u32 %v2230_v10, %v1917_v9  ;;  %v1711_v6 = vld [vmem:[#allocation5 + $0x1d8] sm:$0xf0] }
  0x58   :  { %1010 = vmatpush.bf16.msra.mxu1 %v1726_v25  ;;  %976 = vmatmul.bf16.vlgmr.msrb.gmra.mxu2 %v2472_v57  ;;  %v1645_v16 = vld [vmem:[#allocation5 + $0x148] sm:$0xf]  ;;  %v2162_v19 = vld [vmem:[#allocation5 + $0x154] sm:$0xf0]  ;;  %v1518_v24 = vor.u32 %v2130_v15, %v1517_v14  ;;  %v2208_v7 = vld [vmem:[#allocation5 + $0x2cc] sm:$0xf] }
  0x59   :  { %1024 = vmatpush.bf16.msra.mxu2 %v1854_v26  ;;  %990 = vmatmul.bf16.vlgmr.msrb.gmra.mxu3 %v2476_v2  ;;  %v1773_v20 = vld [vmem:[#allocation5 + $0x248] sm:$0xf]  ;;  %v2194_v21 = vld [vmem:[#allocation5 + $0x254] sm:$0xf0]  ;;  %v1646_v25 = vor.u32 %v2162_v19, %v1645_v16  ;;  %v1839_v8 = vld [vmem:[#allocation5 + $0x2d8] sm:$0xf0] }
  0x5a   :  { %1038 = vmatpush.bf16.msra.mxu3 %v1982_v30  ;;  %v1901_v22 = vld [vmem:[#allocation5 + $0x348] sm:$0xf]  ;;  %v2226_v23 = vld [vmem:[#allocation5 + $0x354] sm:$0xf0]  ;;  %v1774_v26 = vor.u32 %v2194_v21, %v1773_v20  ;;  %v2240_v9 = vld [vmem:[#allocation5 + $0x3cc] sm:$0xf] }
  0x5b   :  { %997 = vmatpush.bf16.msra.mxu0 %v1582_v36  ;;  %v1501_v27 = vld [vmem:[#allocation5 + $0x28] sm:$0xf]  ;;  %v2126_v28 = vld [vmem:[#allocation5 + $0x34] sm:$0xf0]  ;;  %v1902_v30 = vor.u32 %v2226_v23, %v1901_v22  ;;  %v1967_v10 = vld [vmem:[#allocation5 + $0x3d8] sm:$0xf0] }
  0x5c   :  { %1011 = vmatpush.bf16.msra.mxu1 %v1710_v37  ;;  %v1629_v29 = vld [vmem:[#allocation5 + $0x128] sm:$0xf]  ;;  %v2158_v31 = vld [vmem:[#allocation5 + $0x134] sm:$0xf0]  ;;  %v1502_v36 = vor.u32 %v2126_v28, %v1501_v27  ;;  %v2140_v14 = vld [vmem:[#allocation5 + $0xac] sm:$0xf] }
  0x5d   :  { %1025 = vmatpush.bf16.msra.mxu2 %v1838_v38  ;;  %v1757_v32 = vld [vmem:[#allocation5 + $0x228] sm:$0xf]  ;;  %v2190_v33 = vld [vmem:[#allocation5 + $0x234] sm:$0xf0]  ;;  %v1630_v39 = vor.u32 %v2158_v31, %v1629_v29  ;;  %v1567_v15 = vld [vmem:[#allocation5 + $0xb8] sm:$0xf0] }
  0x5e   :  { %1039 = vmatpush.bf16.msra.mxu3 %v1966_v42  ;;  %v1885_v34 = vld [vmem:[#allocation5 + $0x328] sm:$0xf]  ;;  %v2222_v35 = vld [vmem:[#allocation5 + $0x334] sm:$0xf0]  ;;  %v1758_v40 = vor.u32 %v2190_v33, %v1757_v32  ;;  %v2172_v16 = vld [vmem:[#allocation5 + $0x1ac] sm:$0xf] }
  0x5f   :  { %998 = vmatpush.bf16.msra.mxu0 %v1566_v48  ;;  %v1485_v37 = vld [vmem:[#allocation5 + $0x8] sm:$0xf]  ;;  %v2122_v38 = vld [vmem:[#allocation5 + $0x14] sm:$0xf0]  ;;  %v1886_v44 = vor.u32 %v2222_v35, %v1885_v34  ;;  %v2148_v48 = vld [vmem:[#allocation5 + $0xec] sm:$0xf] }
  0x60   :  { %1012 = vmatpush.bf16.msra.mxu1 %v1694_v49  ;;  %v1613_v41 = vld [vmem:[#allocation5 + $0x108] sm:$0xf]  ;;  %v2154_v42 = vld [vmem:[#allocation5 + $0x114] sm:$0xf0]  ;;  %v1599_v49 = vld [vmem:[#allocation5 + $0xf8] sm:$0xf0]  ;;  %v1486_v51 = vor.u32 %v2122_v38, %v1485_v37 }
  0x61   :  { %1026 = vmatpush.bf16.msra.mxu2 %v1822_v50  ;;  %v1741_v43 = vld [vmem:[#allocation5 + $0x208] sm:$0xf]  ;;  %v2186_v45 = vld [vmem:[#allocation5 + $0x214] sm:$0xf0]  ;;  %v2180_v50 = vld [vmem:[#allocation5 + $0x1ec] sm:$0xf]  ;;  %v1614_v55 = vor.u32 %v2154_v42, %v1613_v41 }
  0x62   :  { %1040 = vmatpush.bf16.msra.mxu3 %v1950_v54  ;;  %v1869_v46 = vld [vmem:[#allocation5 + $0x308] sm:$0xf]  ;;  %v2218_v47 = vld [vmem:[#allocation5 + $0x314] sm:$0xf0]  ;;  %v1855_v54 = vld [vmem:[#allocation5 + $0x2f8] sm:$0xf0]  ;;  %v1742_v56 = vor.u32 %v2186_v45, %v1741_v43 }
  0x63   :  { %999 = vmatpush.bf16.msra.mxu0 %v1550_v61  ;;  %v1870_v60 = vor.u32 %v2218_v47, %v1869_v46  ;;  %v1602_v61 = vor.u32 %v2148_v48, %v1599_v49  ;;  %v1695_v19 = vld [vmem:[#allocation5 + $0x1b8] sm:$0xf0]  ;;  %v2204_v20 = vld [vmem:[#allocation5 + $0x2ac] sm:$0xf] }
  0x64   :  { %1013 = vmatpush.bf16.msra.mxu1 %v1678_v62  ;;  %v1730_v62 = vor.u32 %v2180_v50, %v1727_v52  ;;  %v1823_v21 = vld [vmem:[#allocation5 + $0x2b8] sm:$0xf0]  ;;  %v2236_v22 = vld [vmem:[#allocation5 + $0x3ac] sm:$0xf] }
  0x65   :  { %1027 = vmatpush.bf16.msra.mxu2 %v1806_v63  ;;  %v1858_v63 = vor.u32 %v2212_v53, %v1855_v54  ;;  %v1951_v23 = vld [vmem:[#allocation5 + $0x3b8] sm:$0xf0]  ;;  %v2136_v27 = vld [vmem:[#allocation5 + $0x8c] sm:$0xf] }
  0x66   :  { %1041 = vmatpush.bf16.msra.mxu3 %v1934_v5  ;;  %v1986_v5 = vor.u32 %v2244_v58, %v1983_v59  ;;  %v1551_v28 = vld [vmem:[#allocation5 + $0x98] sm:$0xf0]  ;;  %v2168_v29 = vld [vmem:[#allocation5 + $0x18c] sm:$0xf] }
  0x67   :  { %1000 = vmatpush.bf16.msra.mxu0 %v1534_v11  ;;  %v1586_v11 = vor.u32 %v2144_v0, %v1583_v3  ;;  %v1679_v31 = vld [vmem:[#allocation5 + $0x198] sm:$0xf0]  ;;  %v2200_v32 = vld [vmem:[#allocation5 + $0x28c] sm:$0xf] }
  0x68   :  { %1014 = vmatpush.bf16.msra.mxu1 %v1662_v12  ;;  %v1714_v12 = vor.u32 %v2176_v4, %v1711_v6  ;;  %v1807_v33 = vld [vmem:[#allocation5 + $0x298] sm:$0xf0]  ;;  %v2232_v34 = vld [vmem:[#allocation5 + $0x38c] sm:$0xf]  ;;  %v1682_v37 = vor.u32 %v2168_v29, %v1679_v31  ;;  %v2253_v29 = vld [vmem:[#allocation8 + $0x30] sm:$0xff] }
  0x69   :  { %1028 = vmatpush.bf16.msra.mxu2 %v1790_v13  ;;  %v1842_v13 = vor.u32 %v2208_v7, %v1839_v8  ;;  %v1935_v35 = vld [vmem:[#allocation5 + $0x398] sm:$0xf0]  ;;  %v1810_v38 = vor.u32 %v2200_v32, %v1807_v33  ;;  %v2164_v41 = vld [vmem:[#allocation5 + $0x16c] sm:$0xf]  ;;  %v2251_v31 = vld [vmem:[#allocation8 + $0x20] sm:$0xff] }
  0x6a   :  { %1042 = vmatpush.bf16.msra.mxu3 %v1918_v18  ;;  %v1970_v18 = vor.u32 %v2240_v9, %v1967_v10  ;;  %v1938_v42 = vor.u32 %v2232_v34, %v1935_v35  ;;  %v1663_v43 = vld [vmem:[#allocation5 + $0x178] sm:$0xf0]  ;;  %v2228_v46 = vld [vmem:[#allocation5 + $0x36c] sm:$0xf]  ;;  %v2249_v34 = vld [vmem:[#allocation8 + $0x10] sm:$0xff] }
  0x6b   :  { %1001 = vmatpush.bf16.msra.mxu0 %v1518_v24  ;;  %v1570_v24 = vor.u32 %v2140_v14, %v1567_v15  ;;  %v1791_v45 = vld [vmem:[#allocation5 + $0x278] sm:$0xf0]  ;;  %v1666_v49 = vor.u32 %v2164_v41, %v1663_v43  ;;  %v2160_v53 = vld [vmem:[#allocation5 + $0x14c] sm:$0xf]  ;;  %v2261_v35 = vld [vmem:[#allocation8 + $0x70] sm:$0xff] }
  0x6c   :  { %1015 = vmatpush.bf16.msra.mxu1 %v1646_v25  ;;  %v1698_v25 = vor.u32 %v2172_v16, %v1695_v19  ;;  %v1919_v47 = vld [vmem:[#allocation5 + $0x378] sm:$0xf0]  ;;  %v2224_v59 = vld [vmem:[#allocation5 + $0x34c] sm:$0xf] }
  0x6d   :  { %1029 = vmatpush.bf16.msra.mxu2 %v1774_v26  ;;  %v1826_v26 = vor.u32 %v2204_v20, %v1823_v21  ;;  %v1519_v52 = vld [vmem:[#allocation5 + $0x58] sm:$0xf0]  ;;  %v1922_v54 = vor.u32 %v2228_v46, %v1919_v47  ;;  %v2124_v0 = vld [vmem:[#allocation5 + $0x2c] sm:$0xf] }
  0x6e   :  { %1043 = vmatpush.bf16.msra.mxu3 %v1902_v30  ;;  %v1954_v30 = vor.u32 %v2236_v22, %v1951_v23  ;;  %v1775_v58 = vld [vmem:[#allocation5 + $0x258] sm:$0xf0]  ;;  %v2156_v4 = vld [vmem:[#allocation5 + $0x12c] sm:$0xf] }
  0x6f   :  { %1002 = vmatpush.bf16.msra.mxu0 %v1502_v36  ;;  %v1554_v36 = vor.u32 %v2136_v27, %v1551_v28  ;;  %v1503_v3 = vld [vmem:[#allocation5 + $0x38] sm:$0xf0]  ;;  %v2188_v7 = vld [vmem:[#allocation5 + $0x22c] sm:$0xf] }
  0x70   :  { %1016 = vmatpush.bf16.msra.mxu1 %v1630_v39  ;;  %v2132_v39 = vld [vmem:[#allocation5 + $0x6c] sm:$0xf]  ;;  %v1631_v6 = vld [vmem:[#allocation5 + $0x138] sm:$0xf0] }
  0x71   :  { %1030 = vmatpush.bf16.msra.mxu2 %v1758_v40  ;;  %v1535_v40 = vld [vmem:[#allocation5 + $0x78] sm:$0xf0]  ;;  %v2220_v9 = vld [vmem:[#allocation5 + $0x32c] sm:$0xf] }
  0x72   :  { %1044 = vmatpush.bf16.msra.mxu3 %v1886_v44  ;;  %v2196_v44 = vld [vmem:[#allocation5 + $0x26c] sm:$0xf]  ;;  %v1538_v48 = vor.u32 %v2132_v39, %v1535_v40  ;;  %v1759_v8 = vld [vmem:[#allocation5 + $0x238] sm:$0xf0]  ;;  %v2259_v39 = vld [vmem:[#allocation8 + $0x60] sm:$0xff] }
  0x73   :  { %1003 = vmatpush.bf16.msra.mxu0 %v1486_v51  ;;  %v1794_v50 = vor.u32 %v2196_v44, %v1791_v45  ;;  %v2128_v51 = vld [vmem:[#allocation5 + $0x4c] sm:$0xf]  ;;  %v1887_v10 = vld [vmem:[#allocation5 + $0x338] sm:$0xf0] }
  0x74   :  { %1017 = vmatpush.bf16.msra.mxu1 %v1614_v55  ;;  %v1647_v55 = vld [vmem:[#allocation5 + $0x158] sm:$0xf0]  ;;  %v2120_v14 = vld [vmem:[#allocation5 + $0xc] sm:$0xf] }
  0x75   :  { %1031 = vmatpush.bf16.msra.mxu2 %v1742_v56  ;;  %v2192_v56 = vld [vmem:[#allocation5 + $0x24c] sm:$0xf]  ;;  %v1487_v15 = vld [vmem:[#allocation5 + $0x18] sm:$0xf0] }
  0x76   :  { %1045 = vmatpush.bf16.msra.mxu3 %v1870_v60  ;;  %1004 = vmatmul.bf16.vlgmr.msra.gmra.mxu0 %v2474_v1  ;;  %v1903_v60 = vld [vmem:[#allocation5 + $0x358] sm:$0xf0]  ;;  %v2152_v16 = vld [vmem:[#allocation5 + $0x10c] sm:$0xf] }
  0x77   :  { %1052 = vmatpush.bf16.msrb.mxu0 %v1602_v61  ;;  %1018 = vmatmul.bf16.vlgmr.msra.gmra.mxu1 %v2481_v17  ;;  %v1522_v61 = vor.u32 %v2128_v51, %v1519_v52  ;;  %v1615_v19 = vld [vmem:[#allocation5 + $0x118] sm:$0xf0]  ;;  %v2184_v20 = vld [vmem:[#allocation5 + $0x20c] sm:$0xf] }
  0x78   :  { %1066 = vmatpush.bf16.msrb.mxu1 %v1730_v62  ;;  %1032 = vmatmul.bf16.vlgmr.msra.gmra.mxu2 %v2472_v57  ;;  %v1650_v62 = vor.u32 %v2160_v53, %v1647_v55  ;;  %v1743_v21 = vld [vmem:[#allocation5 + $0x218] sm:$0xf0]  ;;  %v2216_v22 = vld [vmem:[#allocation5 + $0x30c] sm:$0xf] }
  0x79   :  { %1080 = vmatpush.bf16.msrb.mxu2 %v1858_v63  ;;  %1046 = vmatmul.bf16.vlgmr.msra.gmra.mxu3 %v2476_v2  ;;  %v1778_v63 = vor.u32 %v2192_v56, %v1775_v58  ;;  %v1871_v23 = vld [vmem:[#allocation5 + $0x318] sm:$0xf0] }
  0x7a   :  { %1094 = vmatpush.bf16.msrb.mxu3 %v1986_v5  ;;  %v1906_v5 = vor.u32 %v2224_v59, %v1903_v60  ;;  %v1874_v27 = vor.u32 %v2216_v22, %v1871_v23  ;;  %v2254_v28 = vld [vmem:[#allocation8 + $0x38] sm:$0xff]  ;;  %v2255_v59 = vld [vmem:[#allocation8 + $0x40] sm:$0xff] }
  0x7b   :  { %1053 = vmatpush.bf16.msrb.mxu0 %v1586_v11  ;;  %v1506_v11 = vor.u32 %v2124_v0, %v1503_v3  ;;  %v2250_v32 = vld [vmem:[#allocation8 + $0x18] sm:$0xff]  ;;  %v2268_v0 = vld [vmem:[#allocation8 + $0xa8] sm:$0xff] }
  0x7c   :  { %1067 = vmatpush.bf16.msrb.mxu1 %v1714_v12  ;;  %v1634_v12 = vor.u32 %v2156_v4, %v1631_v6  ;;  %v2262_v33 = vld [vmem:[#allocation8 + $0x78] sm:$0xff] }
  0x7d   :  { %1081 = vmatpush.bf16.msrb.mxu2 %v1842_v13  ;;  %v1762_v13 = vor.u32 %v2188_v7, %v1759_v8  ;;  %v2258_v44 = vld [vmem:[#allocation8 + $0x58] sm:$0xff]  ;;  %v2267_v7 = vld [vmem:[#allocation8 + $0xa0] sm:$0xff] }
  0x7e   :  { %1095 = vmatpush.bf16.msrb.mxu3 %v1970_v18  ;;  %v1890_v18 = vor.u32 %v2220_v9, %v1887_v10  ;;  %v2270_v60 = vld [vmem:[#allocation8 + $0xb8] sm:$0xff] }
  0x7f   :  { %1054 = vmatpush.bf16.msrb.mxu0 %v1570_v24  ;;  %v1490_v24 = vor.u32 %v2120_v14, %v1487_v15  ;;  %v2266_v10 = vld [vmem:[#allocation8 + $0x98] sm:$0xff] }
  0x80   :  { %1068 = vmatpush.bf16.msrb.mxu1 %v1698_v25  ;;  %v1618_v25 = vor.u32 %v2152_v16, %v1615_v19  ;;  %v2265_v16 = vld [vmem:[#allocation8 + $0x90] sm:$0xff] }
  0x81   :  { %1082 = vmatpush.bf16.msrb.mxu2 %v1826_v26  ;;  %v1746_v26 = vor.u32 %v2184_v20, %v1743_v21  ;;  %v2264_v21 = vld [vmem:[#allocation8 + $0x88] sm:$0xff] }
  0x82   :  { %1096 = vmatpush.bf16.msrb.mxu3 %v1954_v30  ;;  %v2252_v30 = vld [vmem:[#allocation8 + $0x28] sm:$0xff] }
  0x83   :  { %1055 = vmatpush.bf16.msrb.mxu0 %v1554_v36  ;;  %v2260_v36 = vld [vmem:[#allocation8 + $0x68] sm:$0xff] }
  0x84   :  { %1069 = vmatpush.bf16.msrb.mxu1 %v1682_v37 }
  0x85   :  { %1083 = vmatpush.bf16.msrb.mxu2 %v1810_v38 }
  0x86   :  { %1097 = vmatpush.bf16.msrb.mxu3 %v1938_v42 }
  0x87   :  { %1056 = vmatpush.bf16.msrb.mxu0 %v1538_v48  ;;  %v2257_v48 = vld [vmem:[#allocation8 + $0x50] sm:$0xff] }
  0x88   :  { %1070 = vmatpush.bf16.msrb.mxu1 %v1666_v49 }
  0x89   :  { %1084 = vmatpush.bf16.msrb.mxu2 %v1794_v50 }
  0x8a   :  { %1098 = vmatpush.bf16.msrb.mxu3 %v1922_v54  ;;  %v2256_v54 = vld [vmem:[#allocation8 + $0x48] sm:$0xff] }
  0x8b   :  { %1057 = vmatpush.bf16.msrb.mxu0 %v1522_v61 }
  0x8c   :  { %1071 = vmatpush.bf16.msrb.mxu1 %v1650_v62  ;;  %v2269_v62 = vld [vmem:[#allocation8 + $0xb0] sm:$0xff] }
  0x8d   :  { %1085 = vmatpush.bf16.msrb.mxu2 %v1778_v63 }
  0x8e   :  { %1099 = vmatpush.bf16.msrb.mxu3 %v1906_v5 }
  0x8f   :  { %1058 = vmatpush.bf16.msrb.mxu0 %v1506_v11 }
  0x90   :  { %1072 = vmatpush.bf16.msrb.mxu1 %v1634_v12 }
  0x91   :  { %1086 = vmatpush.bf16.msrb.mxu2 %v1762_v13 }
  0x92   :  { %1100 = vmatpush.bf16.msrb.mxu3 %v1890_v18 }
  0x93   :  { %1059 = vmatpush.bf16.msrb.mxu0 %v1490_v24 }
  0x94   :  { %1073 = vmatpush.bf16.msrb.mxu1 %v1618_v25 }
  0x95   :  { %1087 = vmatpush.bf16.msrb.mxu2 %v1746_v26  ;;  %v2263_v26 = vld [vmem:[#allocation8 + $0x80] sm:$0xff] }
  0x96   :  { %1101 = vmatpush.bf16.msrb.mxu3 %v1874_v27  ;;  %1060 = vmatmul.bf16.vlgmr.msrb.gmra.mxu0 %v2474_v1  ;;  %v2248_v1 = vld [vmem:[#allocation8 + $0x8] sm:$0xff] }
  0x97   :  { %1380 = vmatpush.bf16.msra.mxu0 %v2254_v28  ;;  %1074 = vmatmul.bf16.vlgmr.msrb.gmra.mxu1 %v2481_v17  ;;  %v2247_v17 = vld [vmem:[#allocation8] sm:$0xff]  ;;  %v2278_v28 = vld [vmem:[#allocation8 + $0xf8] sm:$0xff] }
  0x98   :  { %1088 = vmatmul.bf16.vlgmr.msrb.gmra.mxu2 %v2472_v57  ;;  %1394 = vmatpush.bf16.msra.mxu1 %v2262_v33  ;;  %v2496_v57 = vld [vmem:[#allocation7] sm:$0xf]  ;;  %v2275_v33 = vld [vmem:[#allocation8 + $0xe0] sm:$0xff] }
  0x99   :  { %1102 = vmatmul.bf16.vlgmr.msrb.gmra.mxu3 %v2476_v2  ;;  %v216_v2 = vperm.slane %v2496_v57, 0  ;;  %1408 = vmatpush.bf16.msra.mxu2 %v2270_v60  ;;  %v217_v3 = vperm.slane %v2496_v57, 1 }
  0x9a   :  { %1422 = vmatpush.bf16.msra.mxu3 %v2278_v28 }
  0x9b   :  { %1381 = vmatpush.bf16.msra.mxu0 %v2253_v29 }
  0x9c   :  { %1395 = vmatpush.bf16.msra.mxu1 %v2261_v35 }
  0x9d   :  { %1409 = vmatpush.bf16.msra.mxu2 %v2269_v62 }
  0x9f   :  { %1382 = vmatpush.bf16.msra.mxu0 %v2252_v30  ;;  %v2277_v30 = vld [vmem:[#allocation8 + $0xf0] sm:$0xff] }
  0xa0   :  { %1396 = vmatpush.bf16.msra.mxu1 %v2260_v36  ;;  %1423 = vmatpush.bf16.msra.mxu3 %v2277_v30 }
  0xa1   :  { %1410 = vmatpush.bf16.msra.mxu2 %v2268_v0 }
  0xa3   :  { %1383 = vmatpush.bf16.msra.mxu0 %v2251_v31  ;;  %v2276_v31 = vld [vmem:[#allocation8 + $0xe8] sm:$0xff] }
  0xa4   :  { %1397 = vmatpush.bf16.msra.mxu1 %v2259_v39  ;;  %1424 = vmatpush.bf16.msra.mxu3 %v2276_v31 }
  0xa5   :  { %1411 = vmatpush.bf16.msra.mxu2 %v2267_v7 }
  0xa7   :  { %1384 = vmatpush.bf16.msra.mxu0 %v2250_v32  ;;  %v218_v32 = vperm.slane %v2496_v57, 2 }
  0xa8   :  { %1398 = vmatpush.bf16.msra.mxu1 %v2258_v44  ;;  %1425 = vmatpush.bf16.msra.mxu3 %v2275_v33 }
  0xa9   :  { %1412 = vmatpush.bf16.msra.mxu2 %v2266_v10 }
  0xab   :  { %1385 = vmatpush.bf16.msra.mxu0 %v2249_v34 }
  0xac   :  { %1399 = vmatpush.bf16.msra.mxu1 %v2257_v48 }
  0xad   :  { %1413 = vmatpush.bf16.msra.mxu2 %v2265_v16 }
  0xaf   :  { %1386 = vmatpush.bf16.msra.mxu0 %v2248_v1 }
  0xb0   :  { %1400 = vmatpush.bf16.msra.mxu1 %v2256_v54  ;;  %v219_v54 = vperm.slane %v2496_v57, 3 }
  0xb1   :  { %1414 = vmatpush.bf16.msra.mxu2 %v2264_v21 }
  0xb3   :  { %1387 = vmatpush.bf16.msra.mxu0 %v2247_v17 }
  0xb4   :  { %1401 = vmatpush.bf16.msra.mxu1 %v2255_v59 }
  0xb5   :  { %1415 = vmatpush.bf16.msra.mxu2 %v2263_v26 }
  0xb6   :  { %v893_v37 = vpop.f32.mrf.mxu0 }
  0xb7   :  { %v894_v38 = vadd.f32 %v893_v37, %v216_v2 }
  0xba   :  { %v907_v40 = vpop.f32.mrf.mxu1 }
  0xbb   :  { %v908_v41 = vadd.f32 %v907_v40, %v894_v38  ;;  %v921_v42 = vpop.f32.mrf.mxu2  ;;  %v2273_v40 = vld [vmem:[#allocation8 + $0xd0] sm:$0xff] }
  0xbd   :  { %v922_v46 = vadd.f32 %v921_v42, %v908_v41 }
  0xbe   :  { %v935_v43 = vpop.f32.mrf.mxu3  ;;  %v895_v45 = vpop.f32.mrf.mxu0 }
  0xbf   :  { %v896_v47 = vadd.f32 %v895_v45, %v216_v2  ;;  %v936_v50 = vadd.f32 %v935_v43, %v922_v46  ;;  %v2274_v2 = vld [vmem:[#allocation8 + $0xd8] sm:$0xff]  ;;  %v2272_v45 = vld [vmem:[#allocation8 + $0xc8] sm:$0xff] }
  0xc0   :  { %1426 = vmatpush.bf16.msra.mxu3 %v2274_v2 }
  0xc1   :  { %v1108_v56 = vmax.f32 %v936_v50, 0.0 }
  0xc2   :  { %v909_v49 = vpop.f32.mrf.mxu1 }
  0xc3   :  { %v910_v51 = vadd.f32 %v909_v49, %v896_v47  ;;  %v923_v52 = vpop.f32.mrf.mxu2 }
  0xc4   :  { %1427 = vmatpush.bf16.msra.mxu3 %v2273_v40 }
  0xc5   :  { %v924_v55 = vadd.f32 %v923_v52, %v910_v51  ;;  %v2271_v51 = vld [vmem:[#allocation8 + $0xc0] sm:$0xff] }
  0xc6   :  { %v937_v53 = vpop.f32.mrf.mxu3 }
  0xc7   :  { %v938_v58 = vadd.f32 %v937_v53, %v924_v55 }
  0xc8   :  { %1428 = vmatpush.bf16.msra.mxu3 %v2272_v45 }
  0xc9   :  { %v1112_v61 = vmax.f32 %v938_v58, 0.0 }
  0xcb   :  { %v1116_v63 = vpack.c.bf16 %v1112_v61, %v1108_v56 }
  0xcc   :  { %1429 = vmatpush.bf16.msra.mxu3 %v2271_v51 }
  0xcd   :  { %1388 = vmatmul.bf16.vlgmr.msra.gmra.mxu0 %v1116_v63 }
  0xd3   :  { %v949_v4 = vpop.f32.mrf.mxu0 }
  0xd4   :  { %v950_v5 = vadd.f32 %v949_v4, %v217_v3  ;;  %v963_v6 = vpop.f32.mrf.mxu1 }
  0xd6   :  { %v964_v8 = vadd.f32 %v963_v6, %v950_v5 }
  0xdb   :  { %v977_v9 = vpop.f32.mrf.mxu2  ;;  %v951_v13 = vpop.f32.mrf.mxu0 }
  0xdc   :  { %v991_v11 = vpop.f32.mrf.mxu3  ;;  %v978_v12 = vadd.f32 %v977_v9, %v964_v8  ;;  %v952_v14 = vadd.f32 %v951_v13, %v217_v3  ;;  %v965_v15 = vpop.f32.mrf.mxu1  ;;  %v2290_v13 = vld [vmem:[%s2512_s4] ss:$0 sm:$0xff]  ;;  %s2428_s4 = smov 128  }
  0xde   :  { %v966_v18 = vadd.f32 %v965_v15, %v952_v14  ;;  %v992_v19 = vadd.f32 %v991_v11, %v978_v12 }
  0xe0   :  { %v1109_v24 = vmax.f32 %v992_v19, 0.0 }
  0xe3   :  { %v979_v20 = vpop.f32.mrf.mxu2 }
  0xe4   :  { %v980_v22 = vadd.f32 %v979_v20, %v966_v18  ;;  %v993_v23 = vpop.f32.mrf.mxu3 }
  0xe6   :  { %v994_v25 = vadd.f32 %v993_v23, %v980_v22 }
  0xe8   :  { %v1113_v27 = vmax.f32 %v994_v25, 0.0 }
  0xea   :  { %v1117_v29 = vpack.c.bf16 %v1113_v27, %v1109_v24 }
  0xec   :  { %1402 = vmatmul.bf16.vlgmr.msra.gmra.mxu1 %v1117_v29 }
  0xf3   :  { %v1005_v34 = vpop.f32.mrf.mxu0 }
  0xf4   :  { %v1006_v35 = vadd.f32 %v1005_v34, %v218_v32  ;;  %v1019_v1 = vpop.f32.mrf.mxu1 }
  0xf6   :  { %v1020_v36 = vadd.f32 %v1019_v1, %v1006_v35 }
  0xfb   :  { %v1033_v17 = vpop.f32.mrf.mxu2  ;;  %v1007_v39 = vpop.f32.mrf.mxu0 }
  0xfc   :  { %v1047_v37 = vpop.f32.mrf.mxu3  ;;  %v1034_v38 = vadd.f32 %v1033_v17, %v1020_v36  ;;  %v1008_v41 = vadd.f32 %v1007_v39, %v218_v32  ;;  %v1021_v42 = vpop.f32.mrf.mxu1 }
  0xfe   :  { %v1022_v43 = vadd.f32 %v1021_v42, %v1008_v41  ;;  %v1048_v44 = vadd.f32 %v1047_v37, %v1034_v38 }
 0x100   :  { %v1110_v49 = vmax.f32 %v1048_v44, 0.0 }
 0x103   :  { %v1035_v46 = vpop.f32.mrf.mxu2 }
 0x104   :  { %v1036_v47 = vadd.f32 %v1035_v46, %v1022_v43  ;;  %v1049_v48 = vpop.f32.mrf.mxu3 }
 0x106   :  { %v1050_v50 = vadd.f32 %v1049_v48, %v1036_v47 }
 0x108   :  { %v1114_v52 = vmax.f32 %v1050_v50, 0.0 }
 0x10a   :  { %v1118_v53 = vpack.c.bf16 %v1114_v52, %v1110_v49 }
 0x10c   :  { %1416 = vmatmul.bf16.vlgmr.msra.gmra.mxu2 %v1118_v53 }
 0x113   :  { %v1061_v55 = vpop.f32.mrf.mxu0 }
 0x114   :  { %v1075_v56 = vpop.f32.mrf.mxu1  ;;  %v1062_v58 = vadd.f32 %v1061_v55, %v219_v54 }
 0x116   :  { %v1076_v60 = vadd.f32 %v1075_v56, %v1062_v58 }
 0x11b   :  { %v1089_v59 = vpop.f32.mrf.mxu2  ;;  %v1063_v62 = vpop.f32.mrf.mxu0 }
 0x11c   :  { %v1103_v61 = vpop.f32.mrf.mxu3  ;;  %v1064_v63 = vadd.f32 %v1063_v62, %v219_v54  ;;  %v1090_v0 = vadd.f32 %v1089_v59, %v1076_v60  ;;  %v1077_v3 = vpop.f32.mrf.mxu1 }
 0x11e   :  { %v1078_v4 = vadd.f32 %v1077_v3, %v1064_v63  ;;  %v1104_v6 = vadd.f32 %v1103_v61, %v1090_v0 }
 0x120   :  { %v1111_v10 = vmax.f32 %v1104_v6, 0.0 }
 0x123   :  { %v1091_v5 = vpop.f32.mrf.mxu2 }
 0x124   :  { %v1092_v7 = vadd.f32 %v1091_v5, %v1078_v4  ;;  %v1105_v8 = vpop.f32.mrf.mxu3 }
 0x126   :  { %v1106_v9 = vadd.f32 %v1105_v8, %v1092_v7 }
 0x128   :  { %v1115_v11 = vmax.f32 %v1106_v9, 0.0 }
 0x12a   :  { %v1119_v12 = vpack.c.bf16 %v1115_v11, %v1111_v10 }
 0x12c   :  { %1430 = vmatmul.bf16.vlgmr.msra.gmra.mxu3 %v1119_v12 }
 0x14a   :  { %v1389_v57 = vpop.f32.mrf.mxu0 }
 0x14b   :  { %v1390_v16 = vadd.f32 %v2290_v13, %v1389_v57 }
 0x152   :  { %v1391_v20 = vpop.f32.mrf.mxu0 }
 0x153   :  { %v1392_v24 = vadd.f32 %v2290_v13, %v1391_v20 }
 0x169   :  { %v1403_v14 = vpop.f32.mrf.mxu1 }
 0x16a   :  { %v1404_v18 = vadd.f32 %v1403_v14, %v1390_v16 }
 0x171   :  { %v1405_v23 = vpop.f32.mrf.mxu1 }
 0x172   :  { %v1406_v26 = vadd.f32 %v1405_v23, %v1392_v24 }
 0x18f   :  { %v1417_v15 = vpop.f32.mrf.mxu2 }
 0x190   :  { %v1418_v19 = vadd.f32 %v1417_v15, %v1404_v18 }
 0x197   :  { %v1419_v25 = vpop.f32.mrf.mxu2 }
 0x198   :  { %v1420_v27 = vadd.f32 %v1419_v25, %v1406_v26 }
 0x1af   :  { %v1431_v21 = vpop.f32.mrf.mxu3 }
 0x1b0   :  { %v1432_v22 = vadd.f32 %v1431_v21, %v1418_v19 }
 0x1b2   :  { %1436 = vst [vmem:[#allocation10] sm:$0xff] %v1432_v22 }
 0x1b7   :  { %v1433_v28 = vpop.f32.mrf.mxu3 }
 0x1b8   :  { %v1434_v29 = vadd.f32 %v1433_v28, %v1420_v27 }
 0x1ba   :  { %1437 = vst [vmem:[#allocation10 + $0x8] sm:$0xff] %v1434_v29 }
 0x1bb   :  { %1450 = dma.vmem_to_hbm [thread:$0]  %s1443_s16, 256, %s1445_s19, [#allocation4], %s2428_s4, %s2428_s4, %s2429_s20  }
 0x1bc   :  { %2417 = dma.done.wait [#allocation4], 256  }
 0x1bd   :  { %2418 = vsyncadd [#allocation4], 4294967040 }
 0x1be   :  { %1455 = vsyncpa [#allocation3], 1 }
 0x1bf   :  { %1456 = vsyncpa [#allocation6], 1 }
 0x1c0   :  { %1457 = vsyncpa [#allocation9], 1 }
 0x1c1   :  { %1458 = vsyncpa [#allocation4], 1 }

</bundles_post_ra>
